<compile_context>
chip_gen: v6e
topology: v6e:2x2x1
jax: 0.10.0
libtpu: 0.0.40
codegen_flags: <defaults>
</compile_context>

<pallas_src>
import jax
import jax.numpy as jnp
from jax import lax
from jax.experimental import pallas as pl
from jax.experimental.pallas import tpu as pltpu


_N_INFLIGHT = 2                            # outstanding HBM->HBM DMAs
_DEFAULT_CHUNK_BYTES = 16 * 1024 * 1024    # per-DMA granularity (no VMEM used)


def _sublane(itemsize):
    # Rows per (sublane, 128) tile for each dtype width.
    return {8: 4, 4: 8, 2: 16, 1: 32}.get(itemsize, 8)


def _plan_chunks(total, itemsize, chunk_bytes):
    """View the flat buffer as a lane-dense (rows, cols) array and split rows
    into DMA slabs: n_full slabs of tb rows plus one ragged tail slab.
    Slab starts are sublane-aligned; each slab is one contiguous DMA.
    Returns (rows, cols, tb, n_full, tail) or None if total % 128 != 0.
    """
    LANE = 128
    sub = _sublane(itemsize)
    cols = None
    for k in (16, 8, 4, 2, 1):             # prefer a wider lane dim
        if total % (LANE * k) == 0:
            cols = LANE * k
            break
    if cols is None:
        return None
    rows = total // cols
    cap_rows = max(1, chunk_bytes // (cols * itemsize))
    if rows >= sub:
        tb = max(sub, (min(rows, cap_rows) // sub) * sub)   # aligned slab starts
    else:
        tb = rows
    n_full = rows // tb
    tail = rows - n_full * tb
    return rows, cols, tb, n_full, tail


def _make_hbm_copy_kernel(tb, n_full, tail):
    """HBM->HBM copy kernel: only DMA descriptor issue, up to _N_INFLIGHT
    copies outstanding, ragged tail as a separate static-size copy."""

    def kernel(x_hbm, o_hbm, sems):
        def slab(start, size, slot):
            return pltpu.make_async_copy(
                x_hbm.at[pl.ds(start, size), :],
                o_hbm.at[pl.ds(start, size), :],
                sems.at[slot],
            )

        n_prime = min(_N_INFLIGHT, n_full)

        # Prime the DMA pipeline (static unroll, <= _N_INFLIGHT descriptors).
        for i in range(n_prime):
            slab(i * tb, tb, i).start()

        # Steady state: wait for the oldest copy in this slot, then reuse it.
        if n_full > n_prime:
            def body(i, carry):
                slot = i % _N_INFLIGHT
                slab((i - _N_INFLIGHT) * tb, tb, slot).wait()
                slab(i * tb, tb, slot).start()
                return carry
            lax.fori_loop(n_prime, n_full, body, 0)

        # Drain copies still in flight (one per primed slot; same size => same
        # semaphore count, so an offset-0 descriptor is a valid wait handle).
        for slot in range(n_prime):
            slab(0, tb, slot).wait()

        # Ragged last slab (static size, sublane-aligned start).
        if tail > 0:
            cp = slab(n_full * tb, tail, 0)
            cp.start()
            cp.wait()

    return kernel


def unflatten(x: jax.Array, out_shape: tuple, *, materialize: bool = False,
              chunk_bytes: int = _DEFAULT_CHUNK_BYTES) -> jax.Array:
    """Pallas equivalent of `input.view(input.size(0), *out_shape)`.

    Default: zero-cost metadata reshape (what torch .view is).
    materialize=True: additionally copies the bytes into a fresh buffer via
    chunked HBM->HBM DMA (no VMEM round-trip, no aliasing).
    """
    B = x.shape[0]
    N = 1
    for d in out_shape:
        N *= d
    assert x.size == B * N, "flat size must match prod(out_shape)"
    target = (B, *out_shape)

    if not materialize:
        # UnFlatten moves no bytes — this is the recommended path.
        return x.reshape(target)

    itemsize = jnp.dtype(x.dtype).itemsize
    plan = _plan_chunks(x.size, itemsize, chunk_bytes)
    if plan is None:
        # TODO(synk): byte-granular 1-D DMA path for sizes not divisible by 128.
        return x.reshape(target)

    rows, cols, tb, n_full, tail = plan
    x2d = x.reshape(rows, cols)                       # metadata only

    copied = pl.pallas_call(
        _make_hbm_copy_kernel(tb, n_full, tail),
        out_shape=jax.ShapeDtypeStruct((rows, cols), x.dtype),
        in_specs=[pl.BlockSpec(memory_space=pl.ANY)],    # raw HBM ref (no auto-DMA)
        out_specs=pl.BlockSpec(memory_space=pl.ANY),     # raw HBM ref (DMA'd manually)
        scratch_shapes=[pltpu.SemaphoreType.DMA((_N_INFLIGHT,))],
    )(x2d)

    return copied.reshape(target)                     # metadata only


if __name__ == "__main__":
    key = jax.random.PRNGKey(0)

    # --- VAE-style UnFlatten: (B, C*H*W) -> (B, C, H, W) ---
    B, C, H, W = 2, 4, 16, 16
    out_shape = (C, H, W)
    x = jax.random.normal(key, (B, C * H * W), dtype=jnp.float32)
    ref = jnp.reshape(x, (B, *out_shape))

    # Default (recommended) path: pure metadata reshape, zero HBM traffic.
    y_view = jax.block_until_ready(unflatten(x, out_shape))
    # Materialized path: exercises the HBM->HBM DMA copy kernel (single slab).
    y_copy = jax.block_until_ready(unflatten(x, out_shape, materialize=True))

    for y in (y_view, y_copy):
        assert y.shape == (B, C, H, W)
        assert y.dtype == x.dtype
        assert bool(jnp.array_equal(y, ref))

    # --- Second shape with a tiny chunk size to exercise the multi-slab
    #     pipelined-DMA loop, the drain phase, and the ragged tail slab. ---
    key2 = jax.random.PRNGKey(0)
    B2, out_shape2 = 4, (8, 116)                      # rows=29, cols=128 view
    x2 = jax.random.normal(key2, (B2, 8 * 116), dtype=jnp.float32)
    ref2 = jnp.reshape(x2, (B2, *out_shape2))
    y2 = jax.block_until_ready(
        unflatten(x2, out_shape2, materialize=True, chunk_bytes=4096))
    assert y2.shape == (B2, *out_shape2)
    assert bool(jnp.array_equal(y2, ref2))

    print("KERNEL_OK")
</pallas_src>

<mosaic_0001>
module attributes {stable_mosaic.version = 11 : i64} {
  func.func @kernel(%arg0: memref<1x2048xf32, #tpu.memory_space<any>>, %arg1: memref<1x2048xf32, #tpu.memory_space<any>>, %arg2: memref<2x!tpu.dma_semaphore, #tpu.memory_space<semaphore_mem>>) attributes {dimension_semantics = [], scalar_prefetch = 0 : i64, scratch_operands = 1 : i64, tpu.core_type = #tpu.core_type<tc>} {
    %c0_i32 = arith.constant 0 : i32
    %c0_i32_0 = arith.constant 0 : i32
    %c0_i32_1 = arith.constant 0 : i32
    %0 = tpu.memref_slice %arg0[%c0_i32_0, %c0_i32_1] : memref<1x2048xf32, #tpu.memory_space<any>> -> memref<1x2048xf32, #tpu.memory_space<any>>
    %c0_i32_2 = arith.constant 0 : i32
    %c0_i32_3 = arith.constant 0 : i32
    %1 = tpu.memref_slice %arg1[%c0_i32_2, %c0_i32_3] : memref<1x2048xf32, #tpu.memory_space<any>> -> memref<1x2048xf32, #tpu.memory_space<any>>
    %2 = tpu.memref_slice %arg2[%c0_i32] : memref<2x!tpu.dma_semaphore, #tpu.memory_space<semaphore_mem>> -> memref<1x!tpu.dma_semaphore, #tpu.memory_space<semaphore_mem>>
    %3 = tpu.memref_squeeze %2 : memref<1x!tpu.dma_semaphore, #tpu.memory_space<semaphore_mem>> -> memref<!tpu.dma_semaphore, #tpu.memory_space<semaphore_mem>>
    tpu.enqueue_dma source(%0 : memref<1x2048xf32, #tpu.memory_space<any>>) target(%1 : memref<1x2048xf32, #tpu.memory_space<any>>) target_semaphore(%3 : memref<!tpu.dma_semaphore, #tpu.memory_space<semaphore_mem>>)
    %c0_i32_4 = arith.constant 0 : i32
    %c0_i32_5 = arith.constant 0 : i32
    %c0_i32_6 = arith.constant 0 : i32
    %4 = tpu.memref_slice %arg0[%c0_i32_5, %c0_i32_6] : memref<1x2048xf32, #tpu.memory_space<any>> -> memref<1x2048xf32, #tpu.memory_space<any>>
    %c0_i32_7 = arith.constant 0 : i32
    %c0_i32_8 = arith.constant 0 : i32
    %5 = tpu.memref_slice %arg1[%c0_i32_7, %c0_i32_8] : memref<1x2048xf32, #tpu.memory_space<any>> -> memref<1x2048xf32, #tpu.memory_space<any>>
    %6 = tpu.memref_slice %arg2[%c0_i32_4] : memref<2x!tpu.dma_semaphore, #tpu.memory_space<semaphore_mem>> -> memref<1x!tpu.dma_semaphore, #tpu.memory_space<semaphore_mem>>
    %7 = tpu.memref_squeeze %6 : memref<1x!tpu.dma_semaphore, #tpu.memory_space<semaphore_mem>> -> memref<!tpu.dma_semaphore, #tpu.memory_space<semaphore_mem>>
    tpu.wait_dma2 semaphore(%7 : memref<!tpu.dma_semaphore, #tpu.memory_space<semaphore_mem>>) src(%4 : memref<1x2048xf32, #tpu.memory_space<any>>) dst(%5 : memref<1x2048xf32, #tpu.memory_space<any>>)
    return
  }
}

</mosaic_0001>

<bundles_post_ra>
// kernel: tpu_custom_call.1
= control target key start
LH: loop header
LB: loop body
LE: loop exit
PB: predicated region body
PF: predicated region fallthrough
CT: control target
= control target key end

     0   :  { %s36_s6 = smov [#allocation2]   ;;  %s37_s7 = smov 131072   ;;  %s55_s0 = inlined_call_operand.hbm [shape: f32[1,2048], index: 0, kind: input, shape index: {}]   ;;  %s56_s1 = inlined_call_operand.hbm [shape: f32[1,2048], index: 1, kind: output, shape index: {}]  }
   0x1   :  { %s38_s8 = smov 0  }
   0x2   :  { %12 = dma.general %s55_s0, 256, %s56_s1, %s36_s6, %s37_s7, [#allocation4], %s38_s8, 0  }
   0x3   :  { %34 = dma.done.wait [#allocation2], 256 }
   0x4   :  { %35 = vsyncadd [#allocation2], 4294967040 }
   0x5   :  { %16 = vsyncmov [#allocation2] }
   0x8   :  { %s17_s13 = vpop.sfrf %16 }
   0x9   :  { %p29_p0 = scmp.ne.s32.totalorder %s17_s13, 0 }
   0xb   :  { %21 = shalt.err (%p29_p0)  }
   0xc   :  { %23 = vsyncmov [#allocation2 + $0x1] }
   0xf   :  { %s24_s14 = vpop.sfrf %23 }
  0x10   :  { %p30_p1 = scmp.ne.s32.totalorder %s24_s14, 0 }
  0x12   :  { %28 = shalt.err (%p30_p1)  }

</bundles_post_ra>
